<compile_context>
chip_gen: v5e
topology: v5e:2x2
jax: 0.10.0
libtpu: 0.0.40
codegen_flags: <defaults>
</compile_context>

<pallas_src>
import functools

import jax
import jax.numpy as jnp
from jax.experimental import pallas as pl
from jax.experimental.pallas import tpu as pltpu


def _embedding_to_word_kernel(x_ref, wt_ref, o_ref, *, normalize_in_kernel):
    # x_ref : (B, E)   input block; constant index_map -> DMA'd once, resident.
    # wt_ref: (E, TW)  contiguous, lane-dense tile of normalized weights^T.
    # o_ref : (B, TW)  cosine-score tile (lane-dense stores, TW multiple of 256).
    if normalize_in_kernel:
        # O(B*E) per step vs. the O(B*E*TW) dot; rsqrt uses the EUP slot and
        # the row reduction the XLU slot, so at small B this is free filler.
        # Zero-norm rows give Inf/NaN, exactly like the PyTorch bare division.
        x = x_ref[...].astype(jnp.float32)
        inv_norm = jax.lax.rsqrt(jnp.sum(x * x, axis=1, keepdims=True))
        xn = (x * inv_norm).astype(wt_ref.dtype)
    else:
        # Wrapper already normalized + cast to the weight dtype (large-B path).
        xn = x_ref[...]
    o_ref[...] = jnp.dot(
        xn, wt_ref[...], preferred_element_type=jnp.float32  # f32 accumulation
    ).astype(o_ref.dtype)


def choose_tile_w(embedding_size, words_count, batch_size,
                  weight_dtype=jnp.bfloat16, out_dtype=jnp.float32,
                  byte_budget=6 << 20):
    """Byte-budget tile sizing for the vocabulary axis.

    Targets ~byte_budget bytes of streamed weight + output tile per grid step
    (amortizes the ~0.35us per-step overhead), rounded down to a multiple of
    256 (MXU width / lane-dense stores), and capped so the grid has at least
    two steps (v7x megacore sharding of the "parallel" W axis).
    """
    wb = jnp.dtype(weight_dtype).itemsize
    ob = jnp.dtype(out_dtype).itemsize
    per_col_bytes = embedding_size * wb + batch_size * ob
    tile_w = max(256, (byte_budget // per_col_bytes) // 256 * 256)
    two_step_cap = max(256, (words_count // 2) // 256 * 256)
    return int(min(tile_w, two_step_cap))


def prepare_norm_weights(embeddings, tile_w, dtype=jnp.bfloat16):
    """init_from_embeddings equivalent, laid out for the kernel.

    Row-normalize the [W, E] word2vec embeddings, cast to `dtype`, zero-pad the
    word axis up to a multiple of tile_w (zero rows score 0 and are sliced off
    later), and reshape tile-major to [n_tiles, E, tile_w] so each grid step
    reads one contiguous HBM slab with the word axis on the 128-lane axis.
    One-time setup cost.
    """
    W, E = embeddings.shape
    norm = embeddings / jnp.linalg.norm(embeddings, axis=1, keepdims=True)
    norm = norm.astype(dtype)
    w_pad = pl.cdiv(W, tile_w) * tile_w
    if w_pad != W:
        norm = jnp.pad(norm, ((0, w_pad - W), (0, 0)))
    # [w_pad, E] -> [n_tiles, tile_w, E] -> [n_tiles, E, tile_w]
    return jnp.transpose(norm.reshape(w_pad // tile_w, tile_w, E), (0, 2, 1))


def embedding_to_word(vectors, weights_tiled, words_count, *,
                      out_dtype=jnp.float32, normalize_in_kernel=None,
                      weight_buffers=2):
    """vectors: [B, E]; weights_tiled: [n_tiles, E, tile_w] -> [B, words_count]."""
    B, E = vectors.shape
    n_tiles, E2, tile_w = weights_tiled.shape
    assert E == E2, (E, E2)
    w_pad = n_tiles * tile_w
    assert words_count <= w_pad
    w_dtype = weights_tiled.dtype

    if normalize_in_kernel is None:
        # At small B the in-kernel recompute is free EUP/XLU filler; at large B
        # it competes with the dot, so normalize + cast once up front instead.
        normalize_in_kernel = B <= 256
    if not normalize_in_kernel:
        xf = vectors.astype(jnp.float32)
        inv = jax.lax.rsqrt(jnp.sum(xf * xf, axis=1, keepdims=True))
        vectors = (xf * inv).astype(w_dtype)

    # Explicit VMEM accounting (keeps big tiles legal under v5e's 16 MiB and
    # v7x's 32 MiB default scoped limits; the byte-budget tile sizing keeps the
    # total well under v7x's 64 MiB physical VMEM).
    nbuf = max(2, weight_buffers)
    x_bytes = B * E * jnp.dtype(vectors.dtype).itemsize
    w_tile_bytes = E * tile_w * jnp.dtype(w_dtype).itemsize
    o_tile_bytes = B * tile_w * jnp.dtype(out_dtype).itemsize
    vmem_need = 2 * x_bytes + nbuf * w_tile_bytes + 2 * o_tile_bytes
    vmem_limit = int(max(vmem_need + (8 << 20), 32 << 20))

    w_spec_kwargs = {}
    if weight_buffers > 2:
        # Deeper buffering for the streaming weight read; only enable if
        # profiling shows exposed weight DMA after the tile_w increase.
        w_spec_kwargs["pipeline_mode"] = pl.Buffered(weight_buffers)

    kernel = functools.partial(
        _embedding_to_word_kernel, normalize_in_kernel=normalize_in_kernel)

    out = pl.pallas_call(
        kernel,
        out_shape=jax.ShapeDtypeStruct((B, w_pad), out_dtype),
        grid_spec=pltpu.PrefetchScalarGridSpec(
            num_scalar_prefetch=0,
            grid=(n_tiles,),
            in_specs=[
                # Full input batch; constant index_map -> stays resident in VMEM.
                pl.BlockSpec((B, E), lambda j: (0, 0)),
                # One contiguous (E, tile_w) weight slab per step; the leading
                # tile axis is squeezed out of the kernel ref.
                pl.BlockSpec((None, E, tile_w), lambda j: (j, 0, 0),
                             **w_spec_kwargs),
            ],
            out_specs=pl.BlockSpec((B, tile_w), lambda j: (0, j)),
        ),
        compiler_params=pltpu.CompilerParams(
            # Independent W tiles -> megacore sharding on v7x (no-op on v5e/v6e).
            dimension_semantics=("parallel",),
            vmem_limit_bytes=vmem_limit,
        ),
    )(vectors, weights_tiled)

    # TODO(synk): optional int8 (v5e/v6e) / fp8-e4m3 (v7x) weight stream with a
    # per-word scale multiplied into the output tile in an epilogue would halve
    # HBM bytes again (~2x on this roofline); needs re-validation of the
    # cosine-score tolerance.
    return out if w_pad == words_count else out[:, :words_count]


def _ref_forward(vectors, embeddings):
    nw = embeddings / jnp.linalg.norm(embeddings, axis=1, keepdims=True)
    nx = vectors / jnp.linalg.norm(vectors, axis=1, keepdims=True)
    return nx @ nw.T


if __name__ == "__main__":
    # Small shapes consistent with the module; words_count is deliberately NOT
    # a multiple of the tile width to exercise the padding / slice path.
    embedding_size = 32
    words_count = 500
    batch = 8

    key = jax.random.PRNGKey(0)
    k_emb, k_vec = jax.random.split(key)
    raw_embeddings = jax.random.normal(
        k_emb, (words_count, embedding_size), jnp.float32)
    vectors = jax.random.normal(k_vec, (batch, embedding_size), jnp.float32)

    tile_w = choose_tile_w(embedding_size, words_count, batch)     # -> 256 (2 grid steps)
    weights_tiled = prepare_norm_weights(raw_embeddings, tile_w)   # [2, 32, 256] bf16

    ref = _ref_forward(vectors, raw_embeddings)

    # Default path: in-kernel normalization (small batch).
    out = embedding_to_word(vectors, weights_tiled, words_count)
    out = jax.block_until_ready(out)
    assert out.shape == (batch, words_count)
    assert out.dtype == jnp.float32
    assert jnp.allclose(out, ref, atol=2e-2, rtol=0.0), \
        float(jnp.max(jnp.abs(out - ref)))

    # Large-batch path (normalize + cast once in the wrapper) -- forced here so
    # both code paths compile and are validated at toy size.
    out2 = embedding_to_word(vectors, weights_tiled, words_count,
                             normalize_in_kernel=False)
    out2 = jax.block_until_ready(out2)
    assert jnp.allclose(out2, ref, atol=3e-2, rtol=0.0), \
        float(jnp.max(jnp.abs(out2 - ref)))

    print("KERNEL_OK")
</pallas_src>

<mosaic_0001>
module attributes {stable_mosaic.version = 11 : i64} {
  func.func @_embedding_to_word_kernel(%arg0: i32, %arg1: memref<8x32xf32, #tpu.memory_space<vmem>>, %arg2: memref<1x32x256xbf16, #tpu.memory_space<vmem>>, %arg3: memref<8x256xf32, #tpu.memory_space<vmem>>) attributes {dimension_semantics = [#tpu.dimension_semantics<parallel>], iteration_bounds = array<i64: 2>, scalar_prefetch = 0 : i64, scratch_operands = 0 : i64, tpu.core_type = #tpu.core_type<tc>, window_params = [{pipeline_mode = #tpu.pipeline_mode<synchronous>, transform_indices = @transform_0, window_bounds = array<i64: 8, 32>}, {transform_indices = @transform_1, window_bounds = array<i64: 1, 32, 256>}, {transform_indices = @transform_2, window_bounds = array<i64: 8, 256>}]} {
    %c0 = arith.constant 0 : index
    %c0_0 = arith.constant 0 : index
    %0 = vector.load %arg1[%c0, %c0_0] : memref<8x32xf32, #tpu.memory_space<vmem>>, vector<8x32xf32>
    %1 = arith.mulf %0, %0 : vector<8x32xf32>
    %cst = arith.constant dense<0.000000e+00> : vector<8xf32>
    %2 = vector.multi_reduction <add>, %1, %cst [1] : vector<8x32xf32> to vector<8xf32>
    %3 = vector.shape_cast %2 : vector<8xf32> to vector<8x1xf32>
    %4 = math.rsqrt %3 : vector<8x1xf32>
    %5 = vector.broadcast %4 : vector<8x1xf32> to vector<8x32xf32>
    %6 = arith.mulf %0, %5 : vector<8x32xf32>
    %7 = arith.truncf %6 : vector<8x32xf32> to vector<8x32xbf16>
    %c0_1 = arith.constant 0 : index
    %c0_2 = arith.constant 0 : index
    %c0_3 = arith.constant 0 : index
    %8 = vector.load %arg2[%c0_1, %c0_2, %c0_3] : memref<1x32x256xbf16, #tpu.memory_space<vmem>>, vector<1x32x256xbf16>
    %9 = vector.shape_cast %8 : vector<1x32x256xbf16> to vector<32x256xbf16>
    %cst_4 = arith.constant dense<0.000000e+00> : vector<8x256xf32>
    %10 = tpu.matmul %7, %9, %cst_4 {dimension_numbers = #tpu.dot_dimension_numbers<[1], [0], [0], [1], [0, 0, 1, 1], [], []>} : vector<8x32xbf16>, vector<32x256xbf16>, vector<8x256xf32> -> vector<8x256xf32>
    %c0_5 = arith.constant 0 : index
    %c0_6 = arith.constant 0 : index
    %11 = vector.load %arg3[%c0_5, %c0_6] : memref<8x256xf32, #tpu.memory_space<vmem>>, vector<8x256xf32>
    tpu.vector_store %arg3[%c0_5, %c0_6], %10 {strides = array<i32>} : memref<8x256xf32, #tpu.memory_space<vmem>>, vector<8x256xf32>,
    return
  }
  func.func @transform_0(%arg0: i32) -> (i32, i32) {
    %c0_i32 = arith.constant 0 : i32
    %c0_i32_0 = arith.constant 0 : i32
    %c0_i32_1 = arith.constant 0 : i32
    return %c0_i32, %c0_i32_0 : i32, i32
  }
  func.func @transform_1(%arg0: i32) -> (i32, i32, i32) {
    %c0_i32 = arith.constant 0 : i32
    %c0_i32_0 = arith.constant 0 : i32
    %c0_i32_1 = arith.constant 0 : i32
    return %arg0, %c0_i32, %c0_i32_0 : i32, i32, i32
  }
  func.func @transform_2(%arg0: i32) -> (i32, i32) {
    %c0_i32 = arith.constant 0 : i32
    %c0_i32_0 = arith.constant 0 : i32
    return %c0_i32, %arg0 : i32, i32
  }
}

</mosaic_0001>

<bundles_post_ra>
// kernel: tpu_custom_call.1
= control target key start
LH: loop header
LB: loop body
LE: loop exit
PB: predicated region body
PF: predicated region fallthrough
CT: control target
= control target key end

     0   :  { %7 = vsyncpa [#allocation3], 0  ;;  %s750_s0 = inlined_call_operand.hbm [shape: f32[8,32], index: 0, kind: input, shape index: {}]   ;;  %s751_s1 = inlined_call_operand.hbm [shape: bf16[2,32,256], index: 1, kind: input, shape index: {}]   ;;  %s752_s2 = inlined_call_operand.hbm [shape: f32[8,512], index: 2, kind: output, shape index: {}]  }
   0x1   :  { %8 = vsyncpa [#allocation6], 0 }
   0x2   :  { %10 = vsyncpa [#allocation6 + $0x1], 0 }
   0x3   :  { %11 = vsyncpa [#allocation4], 0 }
   0x4   :  { %13 = vsyncpa [#allocation4 + $0x1], 0  ;;  %s604_s9 = smov 0   ;;  %s606_s10 = smov 0  }
   0x5   :  { %s608_s11 = smov 0   ;;  %s610_s12 = smov 0  }
   0x6 LB: > { %s625_s13 = sadd.s32 4294967295, %s584_s12   ;;  %s353_s14 = sadd.s32 4294967294, %s584_s12   ;;  %s584_s12 = sphi %s610_s12, %s763_s12   ;;  %s580_s11 = sphi %s608_s11, %s762_s11   ;;  %s576_s10 = sphi %s606_s10, %s761_s10   ;;  %s572_s9 = sphi %s604_s9, %s760_s9  }
   0x7   : > { %s629_s15 = sadd.s32 1, %s584_s12   ;;  %s47_s16 = sadd.s32 1, %s580_s11 }
   0x8   : > { %s44_s17 = ssub.s32 %s584_s12, %s629_s15  ;;  %p54_p0 = scmp.ne.s32.totalorder %s580_s11, %s576_s10 }
   0x9   : > { %p45_p1 = scmp.eq.s32.totalorder %s44_s17, 0  ;;  %p55_p2 = scmp.eq.s32.totalorder %s584_s12, 0 }
   0xa   : > { %p60_p3 = scmp.ne.s32.totalorder %s576_s10, %s572_s9  ;;  %p61_p4 = scmp.eq.s32.totalorder %s625_s13, 0 }
   0xb   : > { %s641_s18 = scalar_select %p45_p1, %s580_s11, %s47_s16  }
   0xc   : > { %p643_p5 = por %p55_p2, %p54_p0  ;;  %p649_p6 = por %p61_p4, %p60_p3 }
   0xd   : > { %p84_p7 = scmp.eq.s32.totalorder %s625_s13, 1  ;;  %p90_p8 = scmp.eq.s32.totalorder %s353_s14, 1 }
   0xe   : > { %p354_p9 = scmp.ge.s32.totalorder %s584_s12, 1  ;;  %p97_p10 = scmp.lt.s32.totalorder %s584_s12, 3 }
   0xf   : > { %p656_p11 = por %p84_p7, %p54_p0  ;;  %p660_p12 = por %p90_p8, %p60_p3 }
  0x10   : > { %p664_p13 = pnand %p354_p9, %p97_p10  ;;  %s109_s26 = sshll.u32 %s750_s0, 4  ;;  %s110_s26 = int_to_ptr.hbm [resolvable:$true] %s109_s26 }
  0x11   : > { %s586_s27 = smov [#allocation2]   ;;  %p414_p3 = scmp.lt.s32.totalorder %s584_s12, 2 }
  0x12   : > { %p401_p1 = pneg %p664_p13  ;;  %s111_s28 = sshll.u32 %s586_s27, 4  ;;  %s112_s28 = int_to_ptr.vmem [resolvable:$true] %s111_s28 }
  0x13   : > { %s122_s29 = sand.u32 1, %s580_s11   ;;  %p680_p7 = pnand %p414_p3, %p643_p5 }
  0x14   : > { %p402_p2 = pnand %p401_p1, %p61_p4  ;;  %s357_s3 = sshll.u32 %s122_s29, 5 }
  0x15   : > { %s387_s4 = sshll.u32 %s584_s12, 5  ;;  %s126_s14 = scalar_lea.vmem [#allocation5], %s357_s3 }
  0x16   : > { %404 = dma.hbm_to_vmem [thread:$0]  (!%p402_p2), %s110_s26, 128, %s112_s28, [#allocation3]  }
  0x17   : > { %s131_s7 = scalar_lea.hbm %s751_s1, %s387_s4  ;;  %s134_s16 = sshll.u32 %s126_s14, 4  ;;  %s135_s16 = int_to_ptr.vmem [resolvable:$true] %s134_s16 }
  0x18   : > { %s132_s8 = sshll.u32 %s131_s7, 4  ;;  %s123_s17 = scalar_lea.sflag [#allocation6], %s122_s29  ;;  %s133_s8 = int_to_ptr.hbm [resolvable:$true] %s132_s8 }
  0x19   : > { %s484_s24 = sshra.s32 %s133_s8, 4  ;;  %p488_p8 = pneg %p680_p7  ;;  %s485_s24 = int_to_ptr.hbm [resolvable:$true] %s484_s24 }
  0x1a   : > { %s486_s19 = scalar_lea.hbm %s485_s24, 32  ;;  %s491_s27 = scalar_lea.hbm %s751_s1, 64 }
  0x1b   : > { %p487_p5 = scmp.ne.s32.totalorder %s485_s24, %s486_s19  ;;  %p492_p1 = scmp.lt.s32.totalorder %s485_s24, %s751_s1 }
  0x1c   : > { %p493_p2 = scmp.lt.s32.totalorder %s491_s27, %s486_s19 }
  0x1d   : > { %p489_p9 = pnand %p488_p8, %p487_p5 }
  0x1e   : > { %p494_p3 = por %p493_p2, %p492_p1 }
  0x1f   : > { %p490_p10 = pneg %p489_p9 }
  0x21   : > { %p495_p0 = pnand %p494_p3, %p490_p10 }
  0x23   : > { %498 = shalt.err (!%p495_p0)
}
  0x24   : > { %s587_s29 = smov 128   ;;  %s588_s3 = smov 8  }
  0x25   : > { %408 = dma.hbm_to_vmem [thread:$0]  (!%p680_p7), %s133_s8, 512, %s135_s16, %s123_s17, %s587_s29, %s587_s29, %s588_s3  }
  0x26   : > { %146 = sbr.rel (%p664_p13) target bundleno = 324 (0x144), region = 28 }
  0x2b   : > { %559 = dma.done.wait (%p61_p4), [#allocation3], 128  }
  0x2c   : > { %561 = vsyncadd (%p61_p4), [#allocation3], 4294967168  ;;  %s705_s5 = sand.u32 1, %s576_s10  }
  0x2d   : > { %s362_s6 = sshll.u32 %s705_s5, 5  ;;  %s154_s7 = scalar_lea.sflag [#allocation6], %s705_s5 }
  0x2e   : > { %s157_s14 = scalar_lea.vmem [#allocation5], %s362_s6 }
  0x2f   : > { %563 = dma.done.wait (%p649_p6), %s154_s7, 512  }
  0x30   : > { %565 = vsyncadd (%p649_p6), %s154_s7, 4294966784  ;;  %v181_v0 = vld [vmem:[#allocation2] sm:$0xff]  ;;  %vm183_vm0 = vcmask 261120   ;;  %v374_v3 = vld [vmem:[%s157_s14 + $0x10] sm:$0xf]  ;;  %s392_s20 = sshll.u32 %s625_s13, 4 }
  0x31   : > { %v182_v1 = vmul.f32 %v181_v0, %v181_v0  ;;  %v391_v4 = vld [vmem:[%s157_s14 + $0x14] sm:$0xf0]  ;;  %v390_v5 = vld [vmem:[%s157_s14 + $0x14] sm:$0xf]  ;;  %v376_v7 = vld [vmem:[%s157_s14 + $0x18] sm:$0xf0]  ;;  %s266_s16 = scalar_lea.hbm %s752_s2, %s392_s20 }
  0x32   : > { %v375_v6 = vor.u32 %v391_v4, %v374_v3  ;;  %v379_v8 = vor.u32 %v390_v5, %v376_v7  ;;  %v366_v9 = vld [vmem:[%s157_s14] sm:$0xf]  ;;  %v389_v10 = vld [vmem:[%s157_s14 + $0x4] sm:$0xf0]  ;;  %v388_v11 = vld [vmem:[%s157_s14 + $0x4] sm:$0xf] }
  0x33   : > { %v184_v2 = vsel %vm183_vm0, %v182_v1, 0.0  ;;  %v367_v12 = vor.u32 %v389_v10, %v366_v9  ;;  %v368_v13 = vld [vmem:[%s157_s14 + $0x8] sm:$0xf0]  ;;  %s363_s23 = sshll.u32 %s705_s5, 4  ;;  %s270_s19 = sshll.u32 %s266_s16, 4  ;;  %s271_s19 = int_to_ptr.hbm [resolvable:$true] %s270_s19 }
  0x34   : > { %185 = vadd.xlane.f32.xlu0 %v184_v2  ;;  %232 = vmatpush.bf16.msra.mxu0 %v375_v6  ;;  %v371_v14 = vor.u32 %v388_v11, %v368_v13  ;;  %s178_s17 = scalar_lea.vmem [#allocation7], %s363_s23  ;;  %s255_s25 = scalar_lea.sflag [#allocation4], %s705_s5 }
  0x35   : > { %245 = vmatpush.bf16.msra.mxu1 %v379_v8  ;;  %s268_s24 = sshll.u32 %s178_s17, 4  ;;  %s528_s26 = sshra.s32 %s271_s19, 4  ;;  %s269_s24 = int_to_ptr.vmem [resolvable:$true] %s268_s24  ;;  %s529_s26 = int_to_ptr.hbm [resolvable:$true] %s528_s26 }
  0x36   : > { %s530_s27 = scalar_lea.hbm %s529_s26, 16  ;;  %s534_s4 = scalar_lea.hbm %s752_s2, 32 }
  0x37   : > { %p531_p4 = scmp.ne.s32.totalorder %s529_s26, %s530_s27  ;;  %p535_p0 = scmp.lt.s32.totalorder %s529_s26, %s752_s2 }
  0x38   : > { %233 = vmatpush.bf16.msra.mxu0 %v367_v12  ;;  %p536_p7 = scmp.lt.s32.totalorder %s534_s4, %s530_s27 }
  0x39   : > { %246 = vmatpush.bf16.msra.mxu1 %v371_v14  ;;  %p532_p6 = pnand %p531_p4, %p656_p11 }
  0x3a   : > { %p537_p5 = por %p536_p7, %p535_p0 }
  0x3b   : > { %p533_p13 = pneg %p532_p6 }
  0x3d   : > { %p538_p8 = pnand %p537_p5, %p533_p13 }
  0xa7   : > { %v186_v15 = vpop.xlane.xlu0 %185 }
  0xa8   : > { %452 = vrsqrt.f32 %v186_v15  ;;  %vm193_vm2 = vweird.f32 %v186_v15 }
  0xae   : > { %v453_v16 = vpop.eup %452 }
  0xaf   : > { %v188_v17 = vmul.f32 %v453_v16, %v186_v15  ;;  %vm194_vm1 = vweird.f32 %v453_v16 }
  0xb0   : > { %vm195_vm3 = vmor %vm193_vm2, %vm194_vm1 }
  0xb1   : > { %v189_v18 = vmul.f32 %v453_v16, %v188_v17 }
  0xb3   : > { %v190_v19 = vmul.f32 0.5, %v189_v18 }
  0xb5   : > { %v191_v20 = vsub.f32 1.5, %v190_v19 }
  0xb7   : > { %v192_v21 = vmul.f32 %v453_v16, %v191_v20 }
  0xb9   : > { %v196_v22 = vsel %vm195_vm3, %v453_v16, %v192_v21 }
  0xba   : > { %v197_v23 = vmul.f32 %v196_v22, %v181_v0 }
  0xbc   : > { %v198_v24 = vpack.c.bf16 %v197_v23, %v197_v23 }
  0xbe   : > { %380 = vmatmul.msk.bf16.vlgmr.msra.gmra.mxu0 %vm183_vm0, %v198_v24  ;;  %381 = vmatmul.msk.bf16.vlgmr.msra.gmra.mxu1 %vm183_vm0, %v198_v24 }
 0x13b   : > { %v235_v25 = vpop.f32.mrf.mxu0  ;;  %v248_v26 = vpop.f32.mrf.mxu1 }
 0x13c   : > { %252 = vst [vmem:[%s178_s17] sm:$0xff] %v235_v25 }
 0x13d   : > { %253 = vst [vmem:[%s178_s17 + $0x8] sm:$0xff] %v248_v26 }
 0x13e   : > { %541 = shalt.err (!%p538_p8)
}
 0x13f   : > { %399 = dma.vmem_to_hbm [thread:$0]  (%p656_p11), %s269_s24, 256, %s271_s19, %s255_s25  }
 0x143   : > { %v237_v27 = vpop.f32.mrf.mxu0  ;;  %v250_v28 = vpop.f32.mrf.mxu1 }
 0x144 PF: > { %s282_s5 = sand.u32 1, %s572_s9   ;;  %p759_p9 = scmp.ge.s32.totalorder %s584_s12, 2 }
 0x145   : > { %s283_s6 = scalar_lea.sflag [#allocation4], %s282_s5 }
 0x146   : > { %p410_p10 = pnand %p759_p9, %p660_p12 }
 0x148   : > { %p411_p1 = pneg %p410_p10 }
 0x14a   : > { %567 = dma.done.wait (%p411_p1), %s283_s6, 256  }
 0x14b   : > { %569 = vsyncadd (%p411_p1), %s283_s6, 4294967040  ;;  %p16_p11 = scmp.ge.s32.totalorder %s629_s15, 4   ;;  %s760_s9 = smov %s576_s10 }
 0x14c   : > { %s761_s10 = smov %s580_s11  ;;  %s762_s11 = smov %s641_s18 }
 0x14d   : > { %s763_s12 = smov %s629_s15  ;;  %18 = sbr.rel (!%p16_p11) target bundleno = 6 (0x6), region = 78 }
 0x152   :  { %289 = vsyncpa [#allocation3], 1 }
 0x153   :  { %291 = vsyncpa [#allocation3 + $0x1], 1 }
 0x154   :  { %292 = vsyncpa [#allocation6], 1 }
 0x155   :  { %294 = vsyncpa [#allocation6 + $0x1], 1 }
 0x156   :  { %295 = vsyncpa [#allocation4], 1 }
 0x157   :  { %297 = vsyncpa [#allocation4 + $0x1], 1 }

</bundles_post_ra>
